<compile_context>
chip_gen: v7x
topology: tpu7x:2x2x1
jax: 0.10.0
libtpu: 0.0.40
codegen_flags: <defaults>
</compile_context>

<pallas_src>
import math

import jax
import jax.numpy as jnp
from jax.experimental import pallas as pl
from jax.experimental.pallas import tpu as pltpu


_LANES = 512  # lane-dense last dim: large multiple of 128 -> full-width stores


def _identity_kernel(spike_ref, out_ref):
    # Forward pass of the (abstract) EVDADModel base class: pass-through.
    # Concrete subclasses would replace this body with their block stack.
    out_ref[...] = spike_ref[...]


def evdad_forward(spike: jax.Array,
                  *,
                  target_block_bytes: int = 2 << 20,
                  skip_copy: bool = False) -> jax.Array:
    """Pallas implementation of EVDADModel.forward for an NCHWT spike tensor.

    spike: (N, C, H, W, T) array (any float/int dtype, any shape).
    Returns an array of identical shape/dtype (identity semantics of the
    abstract base class).
    """
    if skip_copy:
        # Dominant optimization for the abstract identity forward: no HBM
        # round-trip at all.  Kept opt-in so the kernel skeleton is exercised.
        return spike

    orig_shape = spike.shape
    orig_dtype = spike.dtype
    total = math.prod(orig_shape)
    dtype_bytes = jnp.dtype(orig_dtype).itemsize

    # Sublane multiple for the native (8,128)-style tiling of this dtype
    # (f32 -> 8, bf16 -> 16, int8/fp8 -> 32) to avoid relayouts.
    sub = 8 * max(1, 4 // dtype_bytes)

    # Rows of a lane-dense (rows, _LANES) slab holding the flattened tensor.
    rows_needed = pl.cdiv(total, _LANES)
    rows_needed = pl.cdiv(rows_needed, sub) * sub

    # Block rows chosen by byte budget (~2 MiB): large enough for ~85% of the
    # measured HBM copy roofline, small enough that double-buffered in+out
    # (~4x the block) fits every generation's scoped VMEM.
    tr = target_block_bytes // (_LANES * dtype_bytes)
    tr = max(sub, (tr // sub) * sub)
    tr = min(tr, rows_needed)
    if tr == rows_needed and rows_needed >= 2 * sub:
        # Ensure >=2 grid steps so the "parallel" axis can shard across
        # v7x's two TensorCores (harmless on single-TC v5e/v6e).
        tr = max(sub, (rows_needed // 2) // sub * sub)

    rows_padded = pl.cdiv(rows_needed, tr) * tr
    padded_total = rows_padded * _LANES

    flat = spike.reshape(-1)
    if padded_total != total:
        flat = jnp.pad(flat, (0, padded_total - total))
    x2d = flat.reshape(rows_padded, _LANES)

    grid = (rows_padded // tr,)

    # NOTE: for very large tensors a manual HBM->HBM DMA (memory_space=pl.ANY
    # + pltpu.make_async_copy) would skip the VMEM staging entirely; at these
    # block sizes the auto-pipelined copy is already near the HBM roofline.
    out2d = pl.pallas_call(
        _identity_kernel,
        out_shape=jax.ShapeDtypeStruct((rows_padded, _LANES), orig_dtype),
        grid_spec=pltpu.PrefetchScalarGridSpec(
            num_scalar_prefetch=0,
            grid=grid,
            in_specs=[pl.BlockSpec((tr, _LANES), lambda i: (i, 0))],
            out_specs=pl.BlockSpec((tr, _LANES), lambda i: (i, 0)),
        ),
        compiler_params=pltpu.CompilerParams(
            dimension_semantics=("parallel",),
            vmem_limit_bytes=32 << 20,
        ),
        cost_estimate=pl.CostEstimate(
            flops=0,
            transcendentals=0,
            bytes_accessed=2 * padded_total * dtype_bytes,
        ),
        # Output buffer is the donated input slab: no extra HBM allocation.
        input_output_aliases={0: 0},
    )(x2d)

    return out2d.reshape(-1)[:total].reshape(orig_shape)


if __name__ == "__main__":
    key = jax.random.PRNGKey(0)

    # Small SLAYER-style spike tensor: batch=2, channels=4, 16x16 spatial,
    # 8 time steps (NCHWT).
    N, C, H, W, T = 2, 4, 16, 16, 8
    spike = (jax.random.uniform(key, (N, C, H, W, T), dtype=jnp.float32) > 0.7)
    spike = spike.astype(jnp.float32)

    out = evdad_forward(spike)
    out = jax.block_until_ready(out)
    assert out.shape == spike.shape
    assert out.dtype == spike.dtype
    assert bool(jnp.all(out == spike))

    # Awkward (non-128-aligned) shape to exercise the cdiv/padding path.
    key2 = jax.random.PRNGKey(0)
    spike_odd = jax.random.uniform(key2, (1, 3, 17, 13, 5), dtype=jnp.float32)
    out_odd = jax.block_until_ready(evdad_forward(spike_odd))
    assert out_odd.shape == spike_odd.shape
    assert bool(jnp.all(out_odd == spike_odd))

    print("KERNEL_OK")
</pallas_src>

<mosaic_0001>
module attributes {stable_mosaic.version = 11 : i64} {
  func.func @_identity_kernel(%arg0: i32, %arg1: memref<16x512xf32, #tpu.memory_space<vmem>>, %arg2: memref<16x512xf32, #tpu.memory_space<vmem>>) attributes {dimension_semantics = [#tpu.dimension_semantics<parallel>], iteration_bounds = array<i64: 2>, scalar_prefetch = 0 : i64, scratch_operands = 0 : i64, tpu.core_type = #tpu.core_type<tc>, window_params = [{transform_indices = @transform_0, window_bounds = array<i64: 16, 512>}, {transform_indices = @transform_1, window_bounds = array<i64: 16, 512>}]} {
    %c0 = arith.constant 0 : index
    %c0_0 = arith.constant 0 : index
    %0 = vector.load %arg1[%c0, %c0_0] : memref<16x512xf32, #tpu.memory_space<vmem>>, vector<16x512xf32>
    %c0_1 = arith.constant 0 : index
    %c0_2 = arith.constant 0 : index
    %1 = vector.load %arg2[%c0_1, %c0_2] : memref<16x512xf32, #tpu.memory_space<vmem>>, vector<16x512xf32>
    tpu.vector_store %arg2[%c0_1, %c0_2], %0 {strides = array<i32>} : memref<16x512xf32, #tpu.memory_space<vmem>>, vector<16x512xf32>,
    return
  }
  func.func @transform_0(%arg0: i32) -> (i32, i32) {
    %c0_i32 = arith.constant 0 : i32
    %c0_i32_0 = arith.constant 0 : i32
    return %arg0, %c0_i32 : i32, i32
  }
  func.func @transform_1(%arg0: i32) -> (i32, i32) {
    %c0_i32 = arith.constant 0 : i32
    %c0_i32_0 = arith.constant 0 : i32
    return %arg0, %c0_i32 : i32, i32
  }
}

</mosaic_0001>

<bundles_post_ra>
// kernel: tpu_custom_call.1
= control target key start
LH: loop header
LB: loop body
LE: loop exit
PB: predicated region body
PF: predicated region fallthrough
CT: control target
= control target key end

     0   :  { %6 = vsyncpa [#allocation3], 0  ;;  %s588_s0 = inlined_call_operand.hbm [shape: f32[32,512], index: 0, kind: input, shape index: {}, may-alias: {0,1}]   ;;  %s589_s1 = inlined_call_operand.hbm [shape: f32[32,512], index: 1, kind: output, shape index: {}, may-alias: {0,1}]  }
   0x1   :  { %8 = vsyncpa [#allocation3 + $0x1], 0 }
   0x2   :  { %9 = vsyncpa [#allocation4], 0 }
   0x3   :  { %11 = vsyncpa [#allocation4 + $0x1], 0  ;;  %s426_s6 = smov 0   ;;  %s428_s7 = smov 0  }
   0x4   :  { %s430_s8 = smov 0   ;;  %s432_s9 = smov 0  }
   0x5 LB: > { %s447_s10 = sadd.s32 4294967295, %s408_s9   ;;  %s242_s11 = sadd.s32 4294967294, %s408_s9   ;;  %s408_s9 = sphi %s432_s9, %s602_s9   ;;  %s404_s8 = sphi %s430_s8, %s601_s8   ;;  %s400_s7 = sphi %s428_s7, %s600_s7   ;;  %s396_s6 = sphi %s426_s6, %s599_s6  }
   0x6   : > { %s451_s12 = sadd.s32 1, %s408_s9   ;;  %s24_s13 = sadd.s32 1, %s404_s8 }
   0x7   : > { %s21_s14 = ssub.s32 %s408_s9, %s451_s12  ;;  %p31_p0 = scmp.ne.s32.totalorder %s404_s8, %s400_s7 }
   0x8   : > { %p22_p1 = scmp.eq.s32.totalorder %s21_s14, 0  ;;  %p32_p2 = scmp.eq.s32.totalorder %s408_s9, 0 }
   0x9   : > { %p37_p3 = scmp.ne.s32.totalorder %s400_s7, %s396_s6  ;;  %p38_p4 = scmp.eq.s32.totalorder %s447_s10, 0 }
   0xa   : > { %s463_s15 = scalar_select %p22_p1, %s404_s8, %s24_s13  }
   0xb   : > { %p465_p5 = por %p32_p2, %p31_p0  ;;  %p469_p6 = por %p38_p4, %p37_p3 }
   0xc   : > { %p61_p7 = scmp.eq.s32.totalorder %s447_s10, 1  ;;  %p67_p8 = scmp.eq.s32.totalorder %s242_s11, 1 }
   0xd   : > { %p274_p10 = scmp.lt.s32.totalorder %s408_s9, 2  ;;  %s87_s20 = sand.u32 1, %s404_s8  }
   0xe   : > { %p476_p11 = por %p61_p7, %p31_p0  ;;  %p480_p12 = por %p67_p8, %p37_p3 }
   0xf   : > { %s259_s21 = sshll.u32 %s408_s9, 10  ;;  %s245_s22 = sshll.u32 %s87_s20, 6 }
  0x10   : > { %s593_s18 = scalar_select %p476_p11, 1, 0 }
  0x11   : > { %s594_s19 = scalar_select %p480_p12, 1, 0 }
  0x12   : > { %s489_s25 = scalar_lea.hbm %s588_s0, %s259_s21  ;;  %s91_s26 = scalar_lea.vmem [#allocation2], %s245_s22 }
  0x13   : > { %s99_s27 = sshll.u32 %s91_s26, 4  ;;  %p493_p13 = pnand %p274_p10, %p465_p5  ;;  %s497_s27 = int_to_ptr.vmem [resolvable:$true] %s99_s27 }
  0x14   : > { %s499_s29 = scalar_lea.sflag [#allocation3], %s87_s20  ;;  %s312_s30 = scalar_lea.hbm %s489_s25, 1024 }
  0x15   : > { %p313_p0 = scmp.ne.s32.totalorder %s489_s25, %s312_s30  ;;  %p314_p1 = pneg %p493_p13 }
  0x16   : > { %s317_s4 = scalar_lea.hbm %s588_s0, 2048  ;;  %p318_p4 = scmp.lt.u32.totalorder %s489_s25, %s588_s0 }
  0x17   : > { %p315_p2 = pnand %p314_p1, %p313_p0  ;;  %p319_p5 = scmp.lt.u32.totalorder %s317_s4, %s312_s30 }
  0x18   : > { %p321_p8 = scmp.lt.u32.totalorder %s312_s30, %s489_s25 }
  0x19   : > { %p316_p3 = pneg %p315_p2  ;;  %p320_p7 = por %p319_p5, %p318_p4 }
  0x1b   : > { %p322_p10 = por %p321_p8, %p320_p7 }
  0x1d   : > { %p323_p9 = pnand %p322_p10, %p316_p3 }
  0x1f   : > { %326 = shalt.err (!%p323_p9)
}
  0x20   : > { %s327_s13 = scalar_lea.vmem %s497_s27, 1024  ;;  %s410_s14 = smov [#allocation2]  }
  0x21   : > { %p328_p0 = scmp.ne.s32.totalorder %s497_s27, %s327_s13  ;;  %s332_s16 = sshll.u32 %s410_s14, 4  ;;  %s333_s16 = int_to_ptr.vmem [resolvable:$false] %s332_s16 }
  0x22   : > { %s334_s20 = scalar_lea.vmem %s333_s16, 2048  ;;  %p335_p11 = scmp.lt.s32.totalorder %s497_s27, %s333_s16 }
  0x23   : > { %p330_p2 = pnand %p328_p0, %p314_p1  ;;  %p336_p4 = scmp.lt.s32.totalorder %s334_s20, %s327_s13 }
  0x25   : > { %p331_p12 = pneg %p330_p2  ;;  %p337_p5 = por %p336_p4, %p335_p11 }
  0x27   : > { %p338_p7 = pnand %p337_p5, %p331_p12 }
  0x29   : > { %341 = shalt.err (!%p338_p7)
}
  0x2a   : > { %s411_s21 = smov 512   ;;  %s412_s22 = smov 32  }
  0x2b   : > { %269 = dma.hbm_to_vmem [thread:$0]  (!%p493_p13), %s489_s25, 1024, %s497_s27, %s499_s29, %s411_s21, %s411_s21, %s412_s22  }
  0x2c   : > { %p249_p9 = scmp.ge.s32.totalorder %s408_s9, 1  ;;  %p107_p1 = scmp.lt.s32.totalorder %s408_s9, 3 }
  0x2e   : > { %p108_p3 = pnand %p249_p9, %p107_p1 }
  0x2f   : > { %s530_s23 = sand.u32 (!%p108_p3), 1, %s400_s7  }
  0x30   : > { %111 = sbr.rel (%p108_p3) target bundleno = 83 (0x53), region = 24  ;;  %s250_s24 = sshll.u32 (!%p108_p3), %s530_s23, 6 }
  0x31   : > { %s114_s26 = scalar_lea.sflag (!%p108_p3), [#allocation3], %s530_s23  ;;  %s117_s30 = scalar_lea.vmem (!%p108_p3), [#allocation2], %s250_s24 }
  0x37   : > { %387 = dma.done.wait (%p469_p6), %s114_s26, 1024  }
  0x38   : > { %389 = vsyncadd (%p469_p6), %s114_s26, 4294966272  ;;  %s135_s25 = scalar_lea.vmem [#allocation5], %s250_s24  ;;  %s261_s28 = sshll.u32 %s447_s10, 10  ;;  %v138_v0 = vld [vmem:[%s117_s30] sm:$0xff]  ;;  %v139_v1 = vld [vmem:[%s117_s30 + $0x8] sm:$0xff] }
  0x39   : > { %s169_s27 = sshll.u32 %s135_s25, 4  ;;  %v140_v2 = vld [vmem:[%s117_s30 + $0x10] sm:$0xff]  ;;  %s544_s3 = scalar_lea.hbm %s589_s1, %s261_s28  ;;  %146 = vst [vmem:[%s135_s25] sm:$0xff] %v138_v0  ;;  %147 = vst [vmem:[%s135_s25 + $0x8] sm:$0xff] %v139_v1  ;;  %v141_v3 = vld [vmem:[%s117_s30 + $0x18] sm:$0xff]  ;;  %s539_s27 = int_to_ptr.vmem [resolvable:$true] %s169_s27 }
  0x3a   : > { %148 = vst [vmem:[%s135_s25 + $0x10] sm:$0xff] %v140_v2  ;;  %v142_v4 = vld [vmem:[%s117_s30 + $0x20] sm:$0xff]  ;;  %v143_v5 = vld [vmem:[%s117_s30 + $0x28] sm:$0xff]  ;;  %149 = vst [vmem:[%s135_s25 + $0x18] sm:$0xff] %v141_v3  ;;  %s155_s10 = scalar_lea.sflag [#allocation4], %s530_s23  ;;  %s342_s17 = scalar_lea.vmem %s539_s27, 1024 }
  0x3b   : > { %150 = vst [vmem:[%s135_s25 + $0x20] sm:$0xff] %v142_v4  ;;  %151 = vst [vmem:[%s135_s25 + $0x28] sm:$0xff] %v143_v5  ;;  %v144_v6 = vld [vmem:[%s117_s30 + $0x30] sm:$0xff]  ;;  %v145_v7 = vld [vmem:[%s117_s30 + $0x38] sm:$0xff]  ;;  %p343_p6 = scmp.ne.s32.totalorder %s539_s27, %s342_s17  ;;  %p596_p11 = scmp.ne.s32.totalorder %s593_s18, 0 }
  0x3c   : > { %152 = vst [vmem:[%s135_s25 + $0x30] sm:$0xff] %v144_v6  ;;  %153 = vst [vmem:[%s135_s25 + $0x38] sm:$0xff] %v145_v7  ;;  %s413_s4 = smov [#allocation5]  }
  0x3d   : > { %p344_p12 = pnand %p343_p6, %p596_p11  ;;  %s346_s5 = sshll.u32 %s413_s4, 4  ;;  %s347_s5 = int_to_ptr.vmem [resolvable:$false] %s346_s5 }
  0x3e   : > { %s348_s11 = scalar_lea.vmem %s347_s5, 2048  ;;  %p349_p8 = scmp.lt.s32.totalorder %s539_s27, %s347_s5 }
  0x3f   : > { %p345_p13 = pneg %p344_p12  ;;  %p350_p10 = scmp.lt.s32.totalorder %s348_s11, %s342_s17 }
  0x41   : > { %p351_p0 = por %p350_p10, %p349_p8 }
  0x43   : > { %p352_p2 = pnand %p351_p0, %p345_p13 }
  0x45   : > { %355 = shalt.err (!%p352_p2)
}
  0x46   : > { %s356_s13 = scalar_lea.hbm %s544_s3, 1024  ;;  %s360_s20 = scalar_lea.hbm %s589_s1, 2048 }
  0x47   : > { %p357_p4 = scmp.ne.s32.totalorder %s544_s3, %s356_s13  ;;  %p361_p9 = scmp.lt.u32.totalorder %s544_s3, %s589_s1 }
  0x48   : > { %p362_p1 = scmp.lt.u32.totalorder %s360_s20, %s356_s13  ;;  %p364_p6 = scmp.lt.u32.totalorder %s356_s13, %s544_s3 }
  0x49   : > { %p358_p5 = pnand %p357_p4, %p596_p11 }
  0x4a   : > { %p363_p3 = por %p362_p1, %p361_p9 }
  0x4b   : > { %p359_p7 = pneg %p358_p5 }
  0x4c   : > { %p365_p12 = por %p364_p6, %p363_p3 }
  0x4e   : > { %p366_p13 = pnand %p365_p12, %p359_p7 }
  0x50   : > { %369 = shalt.err (!%p366_p13)
}
  0x51   : > { %s414_s24 = smov 512   ;;  %s415_s26 = smov 32  }
  0x52   : > { %264 = dma.vmem_to_hbm [thread:$0]  (%p596_p11), %s539_s27, 1024, %s544_s3, %s155_s10, %s414_s24, %s414_s24, %s415_s26  }
  0x53 PF: > { %s184_s30 = sand.u32 1, %s396_s6   ;;  %p597_p8 = scmp.ne.s32.totalorder %s594_s19, 0 }
  0x54   : > { %p598_p10 = scmp.ge.s32.totalorder %s408_s9, 2  ;;  %s185_s25 = scalar_lea.sflag [#allocation4], %s184_s30 }
  0x56   : > { %p271_p0 = pnand %p598_p10, %p597_p8 }
  0x58   : > { %391 = dma.done.wait (!%p271_p0), %s185_s25, 1024  }
  0x59   : > { %393 = vsyncadd (!%p271_p0), %s185_s25, 4294966272  ;;  %p14_p2 = scmp.ge.s32.totalorder %s451_s12, 4   ;;  %s599_s6 = smov %s400_s7 }
  0x5a   : > { %s600_s7 = smov %s404_s8  ;;  %s601_s8 = smov %s463_s15 }
  0x5b   : > { %s602_s9 = smov %s451_s12  ;;  %16 = sbr.rel (!%p14_p2) target bundleno = 5 (0x5), region = 69 }
  0x62   :  { %190 = vsyncpa [#allocation3], 1 }
  0x63   :  { %192 = vsyncpa [#allocation3 + $0x1], 1 }
  0x64   :  { %193 = vsyncpa [#allocation4], 1 }
  0x65   :  { %195 = vsyncpa [#allocation4 + $0x1], 1 }

</bundles_post_ra>
